<compile_context>
chip_gen: v7x
topology: tpu7x:2x2x1
jax: 0.10.0
libtpu: 0.0.40
codegen_flags: <defaults>
</compile_context>

<pallas_src>
import functools

import jax
import jax.numpy as jnp
from jax.experimental import pallas as pl
from jax.experimental.pallas import tpu as pltpu


def _round_up(x, m):
    return (x + m - 1) // m * m


def _choose_tile_l(l_pad, pad, target):
    """Smallest multiple-of-128 divisor of l_pad that covers max(pad, target)."""
    need = max(pad, min(target, l_pad))
    for t in range(128, l_pad + 1, 128):
        if l_pad % t == 0 and t >= need:
            return t
    return l_pad


def _make_block_kernel(k, dilation, pad, tile_l, has_down, update_carry):
    """Fused TemporalBlock kernel for one (batch, time-tile) grid step.

    ref order: x, w1s, b1, w2s, b2, [wd, bd], out, [x_carry, h_carry]
    """

    def kernel(x_ref, w1_ref, b1_ref, w2_ref, b2_ref, *rest):
        rest = list(rest)
        if has_down:
            wd_ref = rest.pop(0)
            bd_ref = rest.pop(0)
        out_ref = rest.pop(0)
        if pad > 0:
            xc_ref, hc_ref = rest

            # t == 0: carries hold x / h at negative times -> causal zeros.
            @pl.when(pl.program_id(1) == 0)
            def _init_carry():
                xc_ref[...] = jnp.zeros_like(xc_ref)
                hc_ref[...] = jnp.zeros_like(hc_ref)

        x_tile = x_ref[0]                         # (C_in_p, TILE_L), compute dtype
        mm_dtype = x_tile.dtype

        x_ext = (jnp.concatenate([xc_ref[...], x_tile], axis=1)
                 if pad > 0 else x_tile)          # (C_in_p, pad + TILE_L)

        # ---- conv1: k dilated taps stacked into one MXU matmul, f32 accum ----
        x_stack = jnp.concatenate(
            [x_ext[:, j * dilation:j * dilation + tile_l] for j in range(k)],
            axis=0)                               # (k*C_in_p, TILE_L)
        h = jnp.dot(w1_ref[...], x_stack, preferred_element_type=jnp.float32)
        h = jnp.maximum(h + b1_ref[...], 0.0)     # ReLU; chomp == causal indexing
        h_mm = h.astype(mm_dtype)

        # ---- conv2 on h (same dilation), fused ----
        h_ext = (jnp.concatenate([hc_ref[...], h_mm], axis=1)
                 if pad > 0 else h_mm)            # (C_out_p, pad + TILE_L)
        h_stack = jnp.concatenate(
            [h_ext[:, j * dilation:j * dilation + tile_l] for j in range(k)],
            axis=0)                               # (k*C_out_p, TILE_L)
        out = jnp.dot(w2_ref[...], h_stack, preferred_element_type=jnp.float32)
        out = jnp.maximum(out + b2_ref[...], 0.0)

        # ---- residual branch (1x1 downsample or identity) + final ReLU ----
        if has_down:
            res = jnp.dot(wd_ref[...], x_tile, preferred_element_type=jnp.float32)
            res = res + bd_ref[...]
        else:
            res = x_tile.astype(jnp.float32)
        out_ref[0] = jnp.maximum(out + res, 0.0).astype(out_ref.dtype)

        # ---- save the causal halo for the next time tile ----
        if pad > 0 and update_carry:
            xc_ref[...] = x_tile[:, tile_l - pad:]
            hc_ref[...] = h_mm[:, tile_l - pad:]

    return kernel


def _fused_block(xp, layer, c_in, c_in_p, c_out, c_out_p, *, kernel_size,
                 dilation, tile_l_target, compute_dtype):
    """relu(relu(conv2(relu(conv1(x)))) + downsample(x)) for one TemporalBlock."""
    B, _, l_pad = xp.shape
    k = kernel_size
    pad = (k - 1) * dilation
    tile_l = _choose_tile_l(l_pad, pad, tile_l_target)
    nt = l_pad // tile_l
    update_carry = pad <= tile_l              # always true when nt > 1

    def stack_w(w, ci, ci_p):
        # (C_out, C_in, k) -> zero-pad -> (C_out_p, k*C_in_p), tap-major columns.
        co = w.shape[0]
        wp = jnp.zeros((c_out_p, ci_p, k), jnp.float32).at[:co, :ci, :].set(w)
        return (jnp.transpose(wp, (0, 2, 1))
                .reshape(c_out_p, k * ci_p).astype(compute_dtype))

    def pad_bias(b):
        return jnp.zeros((c_out_p, 1), jnp.float32).at[:b.shape[0], 0].set(b)

    w1s = stack_w(layer["w1"], c_in, c_in_p)
    w2s = stack_w(layer["w2"], c_out, c_out_p)
    b1p, b2p = pad_bias(layer["b1"]), pad_bias(layer["b2"])
    has_down = layer["wd"] is not None

    args = [xp, w1s, b1p, w2s, b2p]
    in_specs = [
        pl.BlockSpec((1, c_in_p, tile_l), lambda b, t: (b, 0, t)),
        pl.BlockSpec((c_out_p, k * c_in_p), lambda b, t: (0, 0)),
        pl.BlockSpec((c_out_p, 1), lambda b, t: (0, 0)),
        pl.BlockSpec((c_out_p, k * c_out_p), lambda b, t: (0, 0)),
        pl.BlockSpec((c_out_p, 1), lambda b, t: (0, 0)),
    ]
    if has_down:
        wdp = (jnp.zeros((c_out_p, c_in_p), jnp.float32)
               .at[:c_out, :c_in].set(layer["wd"][:, :, 0]).astype(compute_dtype))
        args += [wdp, pad_bias(layer["bd"])]
        in_specs += [pl.BlockSpec((c_out_p, c_in_p), lambda b, t: (0, 0)),
                     pl.BlockSpec((c_out_p, 1), lambda b, t: (0, 0))]

    scratch = []
    if pad > 0:
        scratch = [pltpu.VMEM((c_in_p, pad), compute_dtype),    # x halo carry
                   pltpu.VMEM((c_out_p, pad), compute_dtype)]   # h halo carry

    kernel = _make_block_kernel(k, dilation, pad, tile_l, has_down, update_carry)
    return pl.pallas_call(
        kernel,
        out_shape=jax.ShapeDtypeStruct((B, c_out_p, l_pad), compute_dtype),
        grid=(B, nt),
        in_specs=in_specs,
        out_specs=pl.BlockSpec((1, c_out_p, tile_l), lambda b, t: (b, 0, t)),
        scratch_shapes=scratch,
        compiler_params=pltpu.CompilerParams(
            # time-tile axis carries the causal halo -> must stay sequential
            dimension_semantics=("parallel", "arbitrary")),
    )(*args)


def temporal_conv_net(x, params, kernel_size=2, *, compute_dtype=jnp.float32,
                      channel_align=8, tile_l_target=512):
    """Forward pass of TemporalConvNet.  x: (B, num_inputs, L).

    compute_dtype=jnp.bfloat16 runs the MXU matmuls in bf16 (f32 accumulation,
    f32 epilogue) -- recommended on v6e/v7x.  channel_align=128 gives
    MXU-native contraction for production-size channel counts.
    """
    B, c0, L = x.shape
    out_dtype = x.dtype
    l_pad = _round_up(max(L, 128), 128)            # lane-dense time axis
    c_in, c_in_p = c0, _round_up(c0, channel_align)
    xp = (jnp.zeros((B, c_in_p, l_pad), compute_dtype)
          .at[:, :c0, :L].set(x.astype(compute_dtype)))

    for i, layer in enumerate(params):
        dilation = 2 ** i
        c_out = layer["w1"].shape[0]
        c_out_p = _round_up(c_out, channel_align)
        xp = _fused_block(xp, layer, c_in, c_in_p, c_out, c_out_p,
                          kernel_size=kernel_size, dilation=dilation,
                          tile_l_target=tile_l_target,
                          compute_dtype=compute_dtype)
        c_in, c_in_p = c_out, c_out_p

    return xp[:, :c_in, :L].astype(out_dtype)


def init_params(key, num_inputs, num_channels, kernel_size):
    """Deterministic synthetic init mirroring the module's parameter shapes.
    weight_norm is realized explicitly: w = g * v / ||v||_(per out-channel)."""
    params = []
    in_c = num_inputs
    for out_c in num_channels:
        key, *ks = jax.random.split(key, 9)

        def wn(kv, kg, shape):
            v = 0.01 * jax.random.normal(kv, shape, jnp.float32)
            g = jnp.abs(jax.random.normal(kg, (shape[0], 1, 1), jnp.float32)) + 0.5
            norm = jnp.sqrt(jnp.sum(v * v, axis=(1, 2), keepdims=True)) + 1e-12
            return g * v / norm

        layer = {
            "w1": wn(ks[0], ks[1], (out_c, in_c, kernel_size)),
            "b1": 0.01 * jax.random.normal(ks[2], (out_c,), jnp.float32),
            "w2": wn(ks[3], ks[4], (out_c, out_c, kernel_size)),
            "b2": 0.01 * jax.random.normal(ks[5], (out_c,), jnp.float32),
            "wd": None,
            "bd": None,
        }
        if in_c != out_c:  # downsample 1x1 conv on the residual path
            layer["wd"] = 0.01 * jax.random.normal(ks[6], (out_c, in_c, 1), jnp.float32)
            layer["bd"] = 0.01 * jax.random.normal(ks[7], (out_c,), jnp.float32)
        params.append(layer)
        in_c = out_c
    return params


# ---- pure-JAX reference (for correctness check only) ----
def _ref_conv(x, w, b, dilation, pad):
    y = jax.lax.conv_general_dilated(
        x, w, window_strides=(1,), padding=[(pad, pad)],
        rhs_dilation=(dilation,), dimension_numbers=("NCH", "OIH", "NCH"),
        precision=jax.lax.Precision.HIGHEST)
    if pad > 0:
        y = y[:, :, :-pad]
    return y + b[None, :, None]


def _ref_forward(x, params, kernel_size=2):
    for i, p in enumerate(params):
        d = 2 ** i
        pad = (kernel_size - 1) * d
        h = jax.nn.relu(_ref_conv(x, p["w1"], p["b1"], d, pad))
        out = jax.nn.relu(_ref_conv(h, p["w2"], p["b2"], d, pad))
        res = x if p["wd"] is None else _ref_conv(x, p["wd"], p["bd"], 1, 0)
        x = jax.nn.relu(out + res)
    return x


def _check(out, ref, atol, rtol):
    assert out.shape == ref.shape, (out.shape, ref.shape)
    assert bool(jnp.all(jnp.isfinite(out))), "non-finite output"
    err = float(jnp.max(jnp.abs(out - ref)))
    assert jnp.allclose(out, ref, atol=atol, rtol=rtol), f"max |err| = {err}"


if __name__ == "__main__":
    key = jax.random.PRNGKey(0)

    # ---- config 1: toy module shapes (single time tile, downsample path) ----
    k1, k2, key = jax.random.split(key, 3)
    B, C0, L, ks = 2, 4, 16, 2
    num_channels = [8, 8]
    x = jax.random.normal(k1, (B, C0, L), jnp.float32)
    params = init_params(k2, C0, num_channels, ks)

    fwd = jax.jit(functools.partial(temporal_conv_net, kernel_size=ks))
    out = jax.block_until_ready(fwd(x, params))
    ref = _ref_forward(x, params, ks)
    _check(out, ref, 1e-4, 1e-3)

    # bf16 compute path (v6e/v7x recommendation): f32 accumulation + epilogue.
    fwd_bf16 = jax.jit(functools.partial(temporal_conv_net, kernel_size=ks,
                                         compute_dtype=jnp.bfloat16))
    out_bf16 = jax.block_until_ready(fwd_bf16(x, params))
    _check(out_bf16, ref, 1e-1, 1e-1)

    # ---- config 2: odd channels, k=3, multi-tile time axis (carry path) ----
    k3, k4, key = jax.random.split(key, 3)
    B2, C2, L2, ks2 = 2, 3, 300, 3
    x2 = jax.random.normal(k3, (B2, C2, L2), jnp.float32)
    params2 = init_params(k4, C2, [5, 7, 7], ks2)
    fwd2 = jax.jit(functools.partial(temporal_conv_net, kernel_size=ks2,
                                     tile_l_target=128))
    out2 = jax.block_until_ready(fwd2(x2, params2))
    ref2 = _ref_forward(x2, params2, ks2)
    _check(out2, ref2, 1e-4, 1e-3)

    print("KERNEL_OK")
</pallas_src>

<mosaic_0001>
module attributes {stable_mosaic.version = 11 : i64} {
  func.func @kernel(%arg0: i32, %arg1: i32, %arg2: memref<1x8x128xf32, #tpu.memory_space<vmem>>, %arg3: memref<8x16xf32, #tpu.memory_space<vmem>>, %arg4: memref<8x1xf32, #tpu.memory_space<vmem>>, %arg5: memref<8x16xf32, #tpu.memory_space<vmem>>, %arg6: memref<8x1xf32, #tpu.memory_space<vmem>>, %arg7: memref<8x8xf32, #tpu.memory_space<vmem>>, %arg8: memref<8x1xf32, #tpu.memory_space<vmem>>, %arg9: memref<1x8x128xf32, #tpu.memory_space<vmem>>, %arg10: memref<8x1xf32, #tpu.memory_space<vmem>>, %arg11: memref<8x1xf32, #tpu.memory_space<vmem>>) attributes {dimension_semantics = [#tpu.dimension_semantics<parallel>, #tpu.dimension_semantics<arbitrary>], iteration_bounds = array<i64: 2, 1>, scalar_prefetch = 0 : i64, scratch_operands = 2 : i64, tpu.core_type = #tpu.core_type<tc>, window_params = [{transform_indices = @transform_0, window_bounds = array<i64: 1, 8, 128>}, {pipeline_mode = #tpu.pipeline_mode<synchronous>, transform_indices = @transform_1, window_bounds = array<i64: 8, 16>}, {pipeline_mode = #tpu.pipeline_mode<synchronous>, transform_indices = @transform_2, window_bounds = array<i64: 8, 1>}, {pipeline_mode = #tpu.pipeline_mode<synchronous>, transform_indices = @transform_3, window_bounds = array<i64: 8, 16>}, {pipeline_mode = #tpu.pipeline_mode<synchronous>, transform_indices = @transform_4, window_bounds = array<i64: 8, 1>}, {pipeline_mode = #tpu.pipeline_mode<synchronous>, transform_indices = @transform_5, window_bounds = array<i64: 8, 8>}, {pipeline_mode = #tpu.pipeline_mode<synchronous>, transform_indices = @transform_6, window_bounds = array<i64: 8, 1>}, {transform_indices = @transform_7, window_bounds = array<i64: 1, 8, 128>}]} {
    %c0_i32 = arith.constant 0 : i32
    %0 = arith.cmpi eq, %arg1, %c0_i32 : i32
    %1 = arith.extui %0 : i1 to i32
    %c0_i32_0 = arith.constant 0 : i32
    %2 = arith.cmpi ne, %1, %c0_i32_0 : i32
    scf.if %2 {
      %cst_31 = arith.constant 0.000000e+00 : f32
      %44 = vector.broadcast %cst_31 : f32 to vector<8x1xf32>
      %c0_32 = arith.constant 0 : index
      %c0_33 = arith.constant 0 : index
      %45 = vector.load %arg10[%c0_32, %c0_33] : memref<8x1xf32, #tpu.memory_space<vmem>>, vector<8x1xf32>
      tpu.vector_store %arg10[%c0_32, %c0_33], %44 {strides = array<i32>} : memref<8x1xf32, #tpu.memory_space<vmem>>, vector<8x1xf32>,
      %cst_34 = arith.constant 0.000000e+00 : f32
      %46 = vector.broadcast %cst_34 : f32 to vector<8x1xf32>
      %c0_35 = arith.constant 0 : index
      %c0_36 = arith.constant 0 : index
      %47 = vector.load %arg11[%c0_35, %c0_36] : memref<8x1xf32, #tpu.memory_space<vmem>>, vector<8x1xf32>
      tpu.vector_store %arg11[%c0_35, %c0_36], %46 {strides = array<i32>} : memref<8x1xf32, #tpu.memory_space<vmem>>, vector<8x1xf32>,
    } else {
    }
    %c0 = arith.constant 0 : index
    %c0_1 = arith.constant 0 : index
    %c0_2 = arith.constant 0 : index
    %3 = vector.load %arg2[%c0, %c0_1, %c0_2] : memref<1x8x128xf32, #tpu.memory_space<vmem>>, vector<1x8x128xf32>
    %4 = vector.shape_cast %3 : vector<1x8x128xf32> to vector<8x128xf32>
    %c0_3 = arith.constant 0 : index
    %c0_4 = arith.constant 0 : index
    %5 = vector.load %arg10[%c0_3, %c0_4] : memref<8x1xf32, #tpu.memory_space<vmem>>, vector<8x1xf32>
    %6 = tpu.concatenate %5, %4 in 1 : vector<8x1xf32>, vector<8x128xf32> -> vector<8x129xf32>
    %7 = vector.extract_strided_slice %6 {offsets = [0, 0], sizes = [8, 128], strides = [1, 1]} : vector<8x129xf32> to vector<8x128xf32>
    %8 = vector.extract_strided_slice %6 {offsets = [0, 1], sizes = [8, 128], strides = [1, 1]} : vector<8x129xf32> to vector<8x128xf32>
    %9 = tpu.concatenate %7, %8 in 0 : vector<8x128xf32>, vector<8x128xf32> -> vector<16x128xf32>
    %c0_5 = arith.constant 0 : index
    %c0_6 = arith.constant 0 : index
    %10 = vector.load %arg3[%c0_5, %c0_6] : memref<8x16xf32, #tpu.memory_space<vmem>>, vector<8x16xf32>
    %cst = arith.constant dense<0.000000e+00> : vector<8x128xf32>
    %11 = tpu.matmul %10, %9, %cst {dimension_numbers = #tpu.dot_dimension_numbers<[1], [0], [0], [1], [0, 0, 1, 1], [], []>} : vector<8x16xf32>, vector<16x128xf32>, vector<8x128xf32> -> vector<8x128xf32>
    %c0_7 = arith.constant 0 : index
    %c0_8 = arith.constant 0 : index
    %12 = vector.load %arg4[%c0_7, %c0_8] : memref<8x1xf32, #tpu.memory_space<vmem>>, vector<8x1xf32>
    %13 = vector.broadcast %12 : vector<8x1xf32> to vector<8x128xf32>
    %14 = arith.addf %11, %13 : vector<8x128xf32>
    %cst_9 = arith.constant 0.000000e+00 : f32
    %15 = vector.broadcast %cst_9 : f32 to vector<8x128xf32>
    %16 = arith.maximumf %14, %15 : vector<8x128xf32>
    %c0_10 = arith.constant 0 : index
    %c0_11 = arith.constant 0 : index
    %17 = vector.load %arg11[%c0_10, %c0_11] : memref<8x1xf32, #tpu.memory_space<vmem>>, vector<8x1xf32>
    %18 = tpu.concatenate %17, %16 in 1 : vector<8x1xf32>, vector<8x128xf32> -> vector<8x129xf32>
    %19 = vector.extract_strided_slice %18 {offsets = [0, 0], sizes = [8, 128], strides = [1, 1]} : vector<8x129xf32> to vector<8x128xf32>
    %20 = vector.extract_strided_slice %18 {offsets = [0, 1], sizes = [8, 128], strides = [1, 1]} : vector<8x129xf32> to vector<8x128xf32>
    %21 = tpu.concatenate %19, %20 in 0 : vector<8x128xf32>, vector<8x128xf32> -> vector<16x128xf32>
    %c0_12 = arith.constant 0 : index
    %c0_13 = arith.constant 0 : index
    %22 = vector.load %arg5[%c0_12, %c0_13] : memref<8x16xf32, #tpu.memory_space<vmem>>, vector<8x16xf32>
    %cst_14 = arith.constant dense<0.000000e+00> : vector<8x128xf32>
    %23 = tpu.matmul %22, %21, %cst_14 {dimension_numbers = #tpu.dot_dimension_numbers<[1], [0], [0], [1], [0, 0, 1, 1], [], []>} : vector<8x16xf32>, vector<16x128xf32>, vector<8x128xf32> -> vector<8x128xf32>
    %c0_15 = arith.constant 0 : index
    %c0_16 = arith.constant 0 : index
    %24 = vector.load %arg6[%c0_15, %c0_16] : memref<8x1xf32, #tpu.memory_space<vmem>>, vector<8x1xf32>
    %25 = vector.broadcast %24 : vector<8x1xf32> to vector<8x128xf32>
    %26 = arith.addf %23, %25 : vector<8x128xf32>
    %cst_17 = arith.constant 0.000000e+00 : f32
    %27 = vector.broadcast %cst_17 : f32 to vector<8x128xf32>
    %28 = arith.maximumf %26, %27 : vector<8x128xf32>
    %c0_18 = arith.constant 0 : index
    %c0_19 = arith.constant 0 : index
    %29 = vector.load %arg7[%c0_18, %c0_19] : memref<8x8xf32, #tpu.memory_space<vmem>>, vector<8x8xf32>
    %cst_20 = arith.constant dense<0.000000e+00> : vector<8x128xf32>
    %30 = tpu.matmul %29, %4, %cst_20 {dimension_numbers = #tpu.dot_dimension_numbers<[1], [0], [0], [1], [0, 0, 1, 1], [], []>} : vector<8x8xf32>, vector<8x128xf32>, vector<8x128xf32> -> vector<8x128xf32>
    %c0_21 = arith.constant 0 : index
    %c0_22 = arith.constant 0 : index
    %31 = vector.load %arg8[%c0_21, %c0_22] : memref<8x1xf32, #tpu.memory_space<vmem>>, vector<8x1xf32>
    %32 = vector.broadcast %31 : vector<8x1xf32> to vector<8x128xf32>
    %33 = arith.addf %30, %32 : vector<8x128xf32>
    %34 = arith.addf %28, %33 : vector<8x128xf32>
    %cst_23 = arith.constant 0.000000e+00 : f32
    %35 = vector.broadcast %cst_23 : f32 to vector<8x128xf32>
    %36 = arith.maximumf %34, %35 : vector<8x128xf32>
    %c0_24 = arith.constant 0 : index
    %c0_25 = arith.constant 0 : index
    %c0_26 = arith.constant 0 : index
    %37 = vector.load %arg9[%c0_24, %c0_25, %c0_26] : memref<1x8x128xf32, #tpu.memory_space<vmem>>, vector<1x8x128xf32>
    %38 = vector.shape_cast %37 : vector<1x8x128xf32> to vector<8x128xf32>
    %39 = vector.shape_cast %36 : vector<8x128xf32> to vector<1x8x128xf32>
    tpu.vector_store %arg9[%c0_24, %c0_25, %c0_26], %39 {strides = array<i32>} : memref<1x8x128xf32, #tpu.memory_space<vmem>>, vector<1x8x128xf32>,
    %40 = vector.extract_strided_slice %4 {offsets = [0, 127], sizes = [8, 1], strides = [1, 1]} : vector<8x128xf32> to vector<8x1xf32>
    %c0_27 = arith.constant 0 : index
    %c0_28 = arith.constant 0 : index
    %41 = vector.load %arg10[%c0_27, %c0_28] : memref<8x1xf32, #tpu.memory_space<vmem>>, vector<8x1xf32>
    tpu.vector_store %arg10[%c0_27, %c0_28], %40 {strides = array<i32>} : memref<8x1xf32, #tpu.memory_space<vmem>>, vector<8x1xf32>,
    %42 = vector.extract_strided_slice %16 {offsets = [0, 127], sizes = [8, 1], strides = [1, 1]} : vector<8x128xf32> to vector<8x1xf32>
    %c0_29 = arith.constant 0 : index
    %c0_30 = arith.constant 0 : index
    %43 = vector.load %arg11[%c0_29, %c0_30] : memref<8x1xf32, #tpu.memory_space<vmem>>, vector<8x1xf32>
    tpu.vector_store %arg11[%c0_29, %c0_30], %42 {strides = array<i32>} : memref<8x1xf32, #tpu.memory_space<vmem>>, vector<8x1xf32>,
    return
  }
  func.func @transform_0(%arg0: i32, %arg1: i32) -> (i32, i32, i32) {
    %c0_i32 = arith.constant 0 : i32
    %c0_i32_0 = arith.constant 0 : i32
    return %arg0, %c0_i32, %arg1 : i32, i32, i32
  }
  func.func @transform_1(%arg0: i32, %arg1: i32) -> (i32, i32) {
    %c0_i32 = arith.constant 0 : i32
    %c0_i32_0 = arith.constant 0 : i32
    %c0_i32_1 = arith.constant 0 : i32
    return %c0_i32, %c0_i32_0 : i32, i32
  }
  func.func @transform_2(%arg0: i32, %arg1: i32) -> (i32, i32) {
    %c0_i32 = arith.constant 0 : i32
    %c0_i32_0 = arith.constant 0 : i32
    %c0_i32_1 = arith.constant 0 : i32
    return %c0_i32, %c0_i32_0 : i32, i32
  }
  func.func @transform_3(%arg0: i32, %arg1: i32) -> (i32, i32) {
    %c0_i32 = arith.constant 0 : i32
    %c0_i32_0 = arith.constant 0 : i32
    %c0_i32_1 = arith.constant 0 : i32
    return %c0_i32, %c0_i32_0 : i32, i32
  }
  func.func @transform_4(%arg0: i32, %arg1: i32) -> (i32, i32) {
    %c0_i32 = arith.constant 0 : i32
    %c0_i32_0 = arith.constant 0 : i32
    %c0_i32_1 = arith.constant 0 : i32
    return %c0_i32, %c0_i32_0 : i32, i32
  }
  func.func @transform_5(%arg0: i32, %arg1: i32) -> (i32, i32) {
    %c0_i32 = arith.constant 0 : i32
    %c0_i32_0 = arith.constant 0 : i32
    %c0_i32_1 = arith.constant 0 : i32
    return %c0_i32, %c0_i32_0 : i32, i32
  }
  func.func @transform_6(%arg0: i32, %arg1: i32) -> (i32, i32) {
    %c0_i32 = arith.constant 0 : i32
    %c0_i32_0 = arith.constant 0 : i32
    %c0_i32_1 = arith.constant 0 : i32
    return %c0_i32, %c0_i32_0 : i32, i32
  }
  func.func @transform_7(%arg0: i32, %arg1: i32) -> (i32, i32, i32) {
    %c0_i32 = arith.constant 0 : i32
    %c0_i32_0 = arith.constant 0 : i32
    return %arg0, %c0_i32, %arg1 : i32, i32, i32
  }
}

module attributes {stable_mosaic.version = 11 : i64} {
  func.func @kernel(%arg0: i32, %arg1: i32, %arg2: memref<1x8x128xf32, #tpu.memory_space<vmem>>, %arg3: memref<8x16xf32, #tpu.memory_space<vmem>>, %arg4: memref<8x1xf32, #tpu.memory_space<vmem>>, %arg5: memref<8x16xf32, #tpu.memory_space<vmem>>, %arg6: memref<8x1xf32, #tpu.memory_space<vmem>>, %arg7: memref<1x8x128xf32, #tpu.memory_space<vmem>>, %arg8: memref<8x2xf32, #tpu.memory_space<vmem>>, %arg9: memref<8x2xf32, #tpu.memory_space<vmem>>) attributes {dimension_semantics = [#tpu.dimension_semantics<parallel>, #tpu.dimension_semantics<arbitrary>], iteration_bounds = array<i64: 2, 1>, scalar_prefetch = 0 : i64, scratch_operands = 2 : i64, tpu.core_type = #tpu.core_type<tc>, window_params = [{transform_indices = @transform_0, window_bounds = array<i64: 1, 8, 128>}, {pipeline_mode = #tpu.pipeline_mode<synchronous>, transform_indices = @transform_1, window_bounds = array<i64: 8, 16>}, {pipeline_mode = #tpu.pipeline_mode<synchronous>, transform_indices = @transform_2, window_bounds = array<i64: 8, 1>}, {pipeline_mode = #tpu.pipeline_mode<synchronous>, transform_indices = @transform_3, window_bounds = array<i64: 8, 16>}, {pipeline_mode = #tpu.pipeline_mode<synchronous>, transform_indices = @transform_4, window_bounds = array<i64: 8, 1>}, {transform_indices = @transform_5, window_bounds = array<i64: 1, 8, 128>}]} {
    %c0_i32 = arith.constant 0 : i32
    %0 = arith.cmpi eq, %arg1, %c0_i32 : i32
    %1 = arith.extui %0 : i1 to i32
    %c0_i32_0 = arith.constant 0 : i32
    %2 = arith.cmpi ne, %1, %c0_i32_0 : i32
    scf.if %2 {
      %cst_26 = arith.constant 0.000000e+00 : f32
      %39 = vector.broadcast %cst_26 : f32 to vector<8x2xf32>
      %c0_27 = arith.constant 0 : index
      %c0_28 = arith.constant 0 : index
      %40 = vector.load %arg8[%c0_27, %c0_28] : memref<8x2xf32, #tpu.memory_space<vmem>>, vector<8x2xf32>
      tpu.vector_store %arg8[%c0_27, %c0_28], %39 {strides = array<i32>} : memref<8x2xf32, #tpu.memory_space<vmem>>, vector<8x2xf32>,
      %cst_29 = arith.constant 0.000000e+00 : f32
      %41 = vector.broadcast %cst_29 : f32 to vector<8x2xf32>
      %c0_30 = arith.constant 0 : index
      %c0_31 = arith.constant 0 : index
      %42 = vector.load %arg9[%c0_30, %c0_31] : memref<8x2xf32, #tpu.memory_space<vmem>>, vector<8x2xf32>
      tpu.vector_store %arg9[%c0_30, %c0_31], %41 {strides = array<i32>} : memref<8x2xf32, #tpu.memory_space<vmem>>, vector<8x2xf32>,
    } else {
    }
    %c0 = arith.constant 0 : index
    %c0_1 = arith.constant 0 : index
    %c0_2 = arith.constant 0 : index
    %3 = vector.load %arg2[%c0, %c0_1, %c0_2] : memref<1x8x128xf32, #tpu.memory_space<vmem>>, vector<1x8x128xf32>
    %4 = vector.shape_cast %3 : vector<1x8x128xf32> to vector<8x128xf32>
    %c0_3 = arith.constant 0 : index
    %c0_4 = arith.constant 0 : index
    %5 = vector.load %arg8[%c0_3, %c0_4] : memref<8x2xf32, #tpu.memory_space<vmem>>, vector<8x2xf32>
    %6 = tpu.concatenate %5, %4 in 1 : vector<8x2xf32>, vector<8x128xf32> -> vector<8x130xf32>
    %7 = vector.extract_strided_slice %6 {offsets = [0, 0], sizes = [8, 128], strides = [1, 1]} : vector<8x130xf32> to vector<8x128xf32>
    %8 = vector.extract_strided_slice %6 {offsets = [0, 2], sizes = [8, 128], strides = [1, 1]} : vector<8x130xf32> to vector<8x128xf32>
    %9 = tpu.concatenate %7, %8 in 0 : vector<8x128xf32>, vector<8x128xf32> -> vector<16x128xf32>
    %c0_5 = arith.constant 0 : index
    %c0_6 = arith.constant 0 : index
    %10 = vector.load %arg3[%c0_5, %c0_6] : memref<8x16xf32, #tpu.memory_space<vmem>>, vector<8x16xf32>
    %cst = arith.constant dense<0.000000e+00> : vector<8x128xf32>
    %11 = tpu.matmul %10, %9, %cst {dimension_numbers = #tpu.dot_dimension_numbers<[1], [0], [0], [1], [0, 0, 1, 1], [], []>} : vector<8x16xf32>, vector<16x128xf32>, vector<8x128xf32> -> vector<8x128xf32>
    %c0_7 = arith.constant 0 : index
    %c0_8 = arith.constant 0 : index
    %12 = vector.load %arg4[%c0_7, %c0_8] : memref<8x1xf32, #tpu.memory_space<vmem>>, vector<8x1xf32>
    %13 = vector.broadcast %12 : vector<8x1xf32> to vector<8x128xf32>
    %14 = arith.addf %11, %13 : vector<8x128xf32>
    %cst_9 = arith.constant 0.000000e+00 : f32
    %15 = vector.broadcast %cst_9 : f32 to vector<8x128xf32>
    %16 = arith.maximumf %14, %15 : vector<8x128xf32>
    %c0_10 = arith.constant 0 : index
    %c0_11 = arith.constant 0 : index
    %17 = vector.load %arg9[%c0_10, %c0_11] : memref<8x2xf32, #tpu.memory_space<vmem>>, vector<8x2xf32>
    %18 = tpu.concatenate %17, %16 in 1 : vector<8x2xf32>, vector<8x128xf32> -> vector<8x130xf32>
    %19 = vector.extract_strided_slice %18 {offsets = [0, 0], sizes = [8, 128], strides = [1, 1]} : vector<8x130xf32> to vector<8x128xf32>
    %20 = vector.extract_strided_slice %18 {offsets = [0, 2], sizes = [8, 128], strides = [1, 1]} : vector<8x130xf32> to vector<8x128xf32>
    %21 = tpu.concatenate %19, %20 in 0 : vector<8x128xf32>, vector<8x128xf32> -> vector<16x128xf32>
    %c0_12 = arith.constant 0 : index
    %c0_13 = arith.constant 0 : index
    %22 = vector.load %arg5[%c0_12, %c0_13] : memref<8x16xf32, #tpu.memory_space<vmem>>, vector<8x16xf32>
    %cst_14 = arith.constant dense<0.000000e+00> : vector<8x128xf32>
    %23 = tpu.matmul %22, %21, %cst_14 {dimension_numbers = #tpu.dot_dimension_numbers<[1], [0], [0], [1], [0, 0, 1, 1], [], []>} : vector<8x16xf32>, vector<16x128xf32>, vector<8x128xf32> -> vector<8x128xf32>
    %c0_15 = arith.constant 0 : index
    %c0_16 = arith.constant 0 : index
    %24 = vector.load %arg6[%c0_15, %c0_16] : memref<8x1xf32, #tpu.memory_space<vmem>>, vector<8x1xf32>
    %25 = vector.broadcast %24 : vector<8x1xf32> to vector<8x128xf32>
    %26 = arith.addf %23, %25 : vector<8x128xf32>
    %cst_17 = arith.constant 0.000000e+00 : f32
    %27 = vector.broadcast %cst_17 : f32 to vector<8x128xf32>
    %28 = arith.maximumf %26, %27 : vector<8x128xf32>
    %29 = arith.addf %28, %4 : vector<8x128xf32>
    %cst_18 = arith.constant 0.000000e+00 : f32
    %30 = vector.broadcast %cst_18 : f32 to vector<8x128xf32>
    %31 = arith.maximumf %29, %30 : vector<8x128xf32>
    %c0_19 = arith.constant 0 : index
    %c0_20 = arith.constant 0 : index
    %c0_21 = arith.constant 0 : index
    %32 = vector.load %arg7[%c0_19, %c0_20, %c0_21] : memref<1x8x128xf32, #tpu.memory_space<vmem>>, vector<1x8x128xf32>
    %33 = vector.shape_cast %32 : vector<1x8x128xf32> to vector<8x128xf32>
    %34 = vector.shape_cast %31 : vector<8x128xf32> to vector<1x8x128xf32>
    tpu.vector_store %arg7[%c0_19, %c0_20, %c0_21], %34 {strides = array<i32>} : memref<1x8x128xf32, #tpu.memory_space<vmem>>, vector<1x8x128xf32>,
    %35 = vector.extract_strided_slice %4 {offsets = [0, 126], sizes = [8, 2], strides = [1, 1]} : vector<8x128xf32> to vector<8x2xf32>
    %c0_22 = arith.constant 0 : index
    %c0_23 = arith.constant 0 : index
    %36 = vector.load %arg8[%c0_22, %c0_23] : memref<8x2xf32, #tpu.memory_space<vmem>>, vector<8x2xf32>
    tpu.vector_store %arg8[%c0_22, %c0_23], %35 {strides = array<i32>} : memref<8x2xf32, #tpu.memory_space<vmem>>, vector<8x2xf32>,
    %37 = vector.extract_strided_slice %16 {offsets = [0, 126], sizes = [8, 2], strides = [1, 1]} : vector<8x128xf32> to vector<8x2xf32>
    %c0_24 = arith.constant 0 : index
    %c0_25 = arith.constant 0 : index
    %38 = vector.load %arg9[%c0_24, %c0_25] : memref<8x2xf32, #tpu.memory_space<vmem>>, vector<8x2xf32>
    tpu.vector_store %arg9[%c0_24, %c0_25], %37 {strides = array<i32>} : memref<8x2xf32, #tpu.memory_space<vmem>>, vector<8x2xf32>,
    return
  }
  func.func @transform_0(%arg0: i32, %arg1: i32) -> (i32, i32, i32) {
    %c0_i32 = arith.constant 0 : i32
    %c0_i32_0 = arith.constant 0 : i32
    return %arg0, %c0_i32, %arg1 : i32, i32, i32
  }
  func.func @transform_1(%arg0: i32, %arg1: i32) -> (i32, i32) {
    %c0_i32 = arith.constant 0 : i32
    %c0_i32_0 = arith.constant 0 : i32
    %c0_i32_1 = arith.constant 0 : i32
    return %c0_i32, %c0_i32_0 : i32, i32
  }
  func.func @transform_2(%arg0: i32, %arg1: i32) -> (i32, i32) {
    %c0_i32 = arith.constant 0 : i32
    %c0_i32_0 = arith.constant 0 : i32
    %c0_i32_1 = arith.constant 0 : i32
    return %c0_i32, %c0_i32_0 : i32, i32
  }
  func.func @transform_3(%arg0: i32, %arg1: i32) -> (i32, i32) {
    %c0_i32 = arith.constant 0 : i32
    %c0_i32_0 = arith.constant 0 : i32
    %c0_i32_1 = arith.constant 0 : i32
    return %c0_i32, %c0_i32_0 : i32, i32
  }
  func.func @transform_4(%arg0: i32, %arg1: i32) -> (i32, i32) {
    %c0_i32 = arith.constant 0 : i32
    %c0_i32_0 = arith.constant 0 : i32
    %c0_i32_1 = arith.constant 0 : i32
    return %c0_i32, %c0_i32_0 : i32, i32
  }
  func.func @transform_5(%arg0: i32, %arg1: i32) -> (i32, i32, i32) {
    %c0_i32 = arith.constant 0 : i32
    %c0_i32_0 = arith.constant 0 : i32
    return %arg0, %c0_i32, %arg1 : i32, i32, i32
  }
}

</mosaic_0001>

<bundles_post_ra>
// kernel: temporal_conv_net.2
= control target key start
LH: loop header
LB: loop body
LE: loop exit
PB: predicated region body
PF: predicated region fallthrough
CT: control target
= control target key end

     0   :  { %s821_s24 = smov 0   ;;  %s823_s25 = smov 0   ;;  %s896_s0 = inlined_call_operand.vmem [shape: f32[2,8,128], index: 0, kind: input, shape index: {}]   ;;  %s897_s1 = inlined_call_operand.vmem [shape: f32[8,16], index: 1, kind: input, shape index: {}]   ;;  %s898_s2 = inlined_call_operand.vmem [shape: f32[8,1], index: 2, kind: input, shape index: {}]   ;;  %s899_s3 = inlined_call_operand.vmem [shape: f32[8,16], index: 3, kind: input, shape index: {}]   ;;  %s900_s4 = inlined_call_operand.vmem [shape: f32[8,1], index: 4, kind: input, shape index: {}]   ;;  %s901_s5 = inlined_call_operand.vmem [shape: f32[8,8], index: 5, kind: input, shape index: {}]   ;;  %s902_s6 = inlined_call_operand.vmem [shape: f32[8,1], index: 6, kind: input, shape index: {}]   ;;  %s903_s7 = inlined_call_operand.vmem [shape: f32[2,8,128], index: 7, kind: output, shape index: {}]  }
   0x1   :  { %s825_s26 = smov 0  }
   0x2 LB: > { %s29_s27 = sadd.s32 1, %s769_s25  ;;  %p668_p0 = scmp.ge.s32.totalorder %s773_s26, 1  ;;  %s773_s26 = sphi %s825_s26, %s17_s26   ;;  %s769_s25 = sphi %s823_s25, %s905_s25   ;;  %s765_s24 = sphi %s821_s24, %s904_s24  }
   0x3   : > { %p31_p1 = scmp.ge.s32.totalorder %s29_s27, 2  ;;  %p255_p2 = scmp.lt.s32.totalorder %s773_s26, 3 }
   0x5   : > { %s907_s27 = smov (%p31_p1, %s29_s27), 0  ;;  %p256_p3 = pnand %p668_p0, %p255_p2 }
   0x6   : > { %p291_p4 = scmp.lt.s32.totalorder (!%p256_p3), %s765_s24, 1  ;;  %vm309_vm0 = vcmask (!%p256_p3), 7168   ;;  %v775_v0 = vmov (!%p256_p3), 0.0   ;;  %s776_s9 = smov (!%p256_p3), 1   ;;  %v777_v2 = vmov (!%p256_p3), 0.0|0.0   ;;  %vm778_vm1 = vmmov (!%p256_p3), 0  }
   0x7   : > { %259 = sbr.rel (%p256_p3) target bundleno = 937 (0x3a9), region = 48  ;;  %310 = vst.msk [vmem:[#allocation2] sm:$0xff] (!%p256_p3), %vm309_vm0, %v775_v0  ;;  %311 = vst.msk [vmem:[#allocation3] sm:$0xff] (!%p256_p3), %vm309_vm0, %v775_v0  ;;  %703 = vmatprep.subr.bf16.mxu0 (!%p256_p3), %v777_v2  ;;  %706 = vmatprep.subr.bf16.mxu1 (!%p256_p3), %v777_v2  ;;  %v329_v4 = vld [vmem:[%s898_s2] sm:$0xff] (!%p256_p3)  ;;  %v779_v6 = vmov (!%p256_p3), 0   ;;  %s780_s12 = smov (!%p256_p3), 127  }
   0x8   : > { %688 = vmatprep.mubr.msk.f32.mxu0 (!%p256_p3), %vm778_vm1, %v775_v0  ;;  %695 = vmatprep.mubr.msk.f32.mxu1 (!%p256_p3), %vm778_vm1, %v775_v0  ;;  %vm325_vm2 = vcmask (!%p256_p3), 1039360   ;;  %v328_v14 = vld [vmem:[%s897_s1] sm:$0xff] (!%p256_p3)  ;;  %vm335_vm3 = vcmask (!%p256_p3), 130048   ;;  %vm511_vm4 = vcmask (!%p256_p3), 64512  }
   0x9   : > { %744 = vset.pattern.permute.xlu1 (!%p256_p3), %v779_v6  ;;  %750 = vset.pattern.permute.xlu0 (!%p256_p3), %v779_v6  ;;  %v424_v20 = vld [vmem:[%s900_s4] sm:$0xff] (!%p256_p3) }
   0xa   : > { %332 = vperm.xlu1 (!%p256_p3), %744, %v329_v4   ;;  %v504_v22 = vld [vmem:[%s901_s5] sm:$0xff] (!%p256_p3) }
   0xb   : > { %v505_v26 = vld [vmem:[%s902_s6] sm:$0xff] (!%p256_p3) }
   0xc   : > { %v423_v32 = vld [vmem:[%s899_s3] sm:$0xff] (!%p256_p3) }
   0xe   : > { %s909_s24 = smov (!%p291_p4, %s765_s24), 1  ;;  %v313_v3 = vld [vmem:[#allocation2] sm:$0xff]  ;;  %v410_v21 = vld [vmem:[#allocation3] sm:$0xff] }
   0xf   : > { %s669_s28 = sshll.u32 %s909_s24, 3 }
  0x10   : > { %s297_s8 = scalar_lea.vmem %s896_s0, %s669_s28  ;;  %s304_s30 = scalar_lea.vmem %s903_s7, %s669_s28 }
  0x11   : > { %v312_v1 = vld [vmem:[%s297_s8] sm:$0xff] }
  0x12   : > { %315 = vrot.lane.b32.xlu0 %v312_v1, %s776_s9 }
  0x84   : > { %v316_v5 = vpop.permute.xlu0 %315 }
  0x85   : > { %v319_v7 = vsel %vm309_vm0, %v313_v3, %v316_v5  ;;  %588 = vst.msk [vmem:[#allocation2] sm:$0xff] %vm309_vm0, %v316_v5 }
  0x86   : > { %v739_v8 = vpack.i.bf16 %v316_v5, %v319_v7 }
  0x88   : > { %740 = vrot.lane.b32.xlu0 %v739_v8, %s780_s12 }
  0x89   : > { %v333_v15 = vpop.permute.xlu1 %332 }
  0xfa   : > { %v741_v9 = vpop.permute.xlu0 %740 }
  0xfb   : > { %v743_v10 = vunpack.i.h.bf16 %v741_v9  ;;  %v742_v11 = vunpack.i.l.bf16 %v741_v9 }
  0xfd   : > { %v326_v12 = vsel %vm325_vm2, %v742_v11, %v743_v10 }
  0xfe   : > { %v704_v13 = vpack.c.bf16 %v326_v12, %v319_v7 }
 0x100   : > { %705 = vmatpush3.bf16.msra.mxu0 %v704_v13 }
 0x101   : > { %698 = vmatprep.subr.mxu0 %v775_v0 }
 0x103   : > { %689 = vmatmul.mubr.msk.f32.vlgmr.msra.gmra.mrb[0].mxu0 %vm335_vm3, %v328_v14 }
 0x104   : > { %699 = vmatpush3.msra.mxu0 %v312_v1  ;;  %700 = vmatprep.mubr.msk.f32.mxu0 %vm778_vm1, %v775_v0 }
 0x107   : > { %701 = vmatmul.mubr.msk.f32.vlgmr.msra.gmra.mrb[2].mxu0 %vm511_vm4, %v504_v22 }
 0x1d6   : > { %v405_v16 = vpop.f32.mrb[0].mxu0 }
 0x1d7   : > { %v406_v17 = vadd.f32 %v405_v16, %v333_v15  ;;  %v690_v18 = vpop.f32.mrb[1].mxu0 }
 0x1d9   : > { %v409_v19 = vmax.f32 %v406_v17, 0.0 }
 0x1da   : > { %v581_v33 = vpop.f32.mrb[2].mxu0 }
 0x1db   : > { %412 = vrot.lane.b32.xlu1 %v409_v19, %s776_s9  ;;  %v702_v34 = vpop.f32.mrb[3].mxu0 }
 0x1df   : > { %427 = vperm.xlu1 %744, %v424_v20  }
 0x24d   : > { %v413_v23 = vpop.permute.xlu1 %412 }
 0x24e   : > { %v415_v24 = vsel %vm309_vm0, %v410_v21, %v413_v23  ;;  %589 = vst.msk [vmem:[#allocation3] sm:$0xff] %vm309_vm0, %v413_v23 }
 0x24f   : > { %v745_v25 = vpack.i.bf16 %v413_v23, %v415_v24 }
 0x251   : > { %746 = vrot.lane.b32.xlu0 %v745_v25, %s780_s12 }
 0x255   : > { %508 = vperm.xlu0 %750, %v505_v26  }
 0x25e   : > { %v428_v36 = vpop.permute.xlu1 %427 }
 0x2c3   : > { %v747_v27 = vpop.permute.xlu0 %746 }
 0x2c4   : > { %v749_v28 = vunpack.i.h.bf16 %v747_v27  ;;  %v748_v29 = vunpack.i.l.bf16 %v747_v27 }
 0x2c6   : > { %v421_v30 = vsel %vm325_vm2, %v748_v29, %v749_v28 }
 0x2c7   : > { %v707_v31 = vpack.c.bf16 %v421_v30, %v415_v24 }
 0x2c9   : > { %708 = vmatpush3.bf16.msra.mxu1 %v707_v31 }
 0x2cc   : > { %696 = vmatmul.mubr.msk.f32.vlgmr.msra.gmra.mrb[0].mxu1 %vm335_vm3, %v423_v32 }
 0x2d4   : > { %v509_v35 = vpop.permute.xlu0 %508 }
 0x2d5   : > { %v582_v40 = vadd.f32 %v581_v33, %v509_v35 }
 0x39f   : > { %v499_v37 = vpop.f32.mrb[0].mxu1 }
 0x3a0   : > { %v500_v38 = vadd.f32 %v499_v37, %v428_v36  ;;  %v697_v39 = vpop.f32.mrb[1].mxu1 }
 0x3a2   : > { %v503_v41 = vmax.f32 %v500_v38, 0.0 }
 0x3a4   : > { %v585_v42 = vadd.f32 %v582_v40, %v503_v41 }
 0x3a6   : > { %v586_v43 = vmax.f32 %v585_v42, 0.0 }
 0x3a8   : > { %587 = vst [vmem:[%s304_s30] sm:$0xff] %v586_v43 }
 0x3a9 PF: > { %s17_s26 = sadd.s32 1, %s773_s26   ;;  %s904_s24 = smov %s769_s25 }
 0x3aa   : > { %p14_p5 = scmp.ge.s32.totalorder %s17_s26, 4   ;;  %s905_s25 = smov %s907_s27 }
 0x3ac   :  { %16 = sbr.rel (!%p14_p5) target bundleno = 2 (0x2), region = 82 }

// kernel: temporal_conv_net.3
= control target key start
LH: loop header
LB: loop body
LE: loop exit
PB: predicated region body
PF: predicated region fallthrough
CT: control target
= control target key end

     0   :  { %10 = vsyncpa [#allocation5], 0  ;;  %s904_s0 = inlined_call_operand.vmem [shape: f32[2,8,128], index: 0, kind: input, shape index: {}]   ;;  %s905_s1 = inlined_call_operand.vmem [shape: f32[8,16], index: 1, kind: input, shape index: {}]   ;;  %s906_s2 = inlined_call_operand.vmem [shape: f32[8,1], index: 2, kind: input, shape index: {}]   ;;  %s907_s3 = inlined_call_operand.vmem [shape: f32[8,16], index: 3, kind: input, shape index: {}]   ;;  %s908_s4 = inlined_call_operand.vmem [shape: f32[8,1], index: 4, kind: input, shape index: {}]   ;;  %s909_s5 = inlined_call_operand.hbm [shape: f32[2,8,128], index: 5, kind: output, shape index: {}]  }
   0x1   :  { %12 = vsyncpa [#allocation5 + $0x1], 0  ;;  %s764_s18 = smov 0   ;;  %s766_s19 = smov 0  }
   0x2   :  { %s768_s20 = smov 0   ;;  %s770_s21 = smov 0  }
   0x3   :  { %s772_s22 = smov 0   ;;  %s774_s23 = smov 0  }
   0x4 LB: > { %s535_s24 = sadd.s32 4294967295, %s725_s23   ;;  %s536_s25 = sadd.s32 4294967294, %s725_s23   ;;  %s725_s23 = sphi %s774_s23, %s18_s23   ;;  %s721_s22 = sphi %s772_s22, %s916_s22   ;;  %s717_s21 = sphi %s770_s21, %s915_s21   ;;  %s713_s20 = sphi %s768_s20, %s914_s20   ;;  %s709_s19 = sphi %s766_s19, %s913_s19   ;;  %s705_s18 = sphi %s764_s18, %s912_s18  }
   0x5   : > { %s30_s26 = sadd.s32 1, %s721_s22  ;;  %s151_s27 = sadd.s32 1, %s713_s20 }
   0x6   : > { %p32_p0 = scmp.ge.s32.totalorder %s30_s26, 2  ;;  %p161_p1 = scmp.ne.s32.totalorder %s713_s20, %s709_s19 }
   0x7   : > { %p162_p2 = scmp.eq.s32.totalorder %s535_s24, 1  ;;  %p167_p3 = scmp.ne.s32.totalorder %s709_s19, %s705_s18 }
   0x8   : > { %s918_s26 = smov (%p32_p0, %s30_s26), 0  ;;  %p168_p5 = scmp.eq.s32.totalorder %s536_s25, 1 }
   0x9   : > { %p804_p4 = por %p162_p2, %p161_p1  ;;  %s146_s29 = ssub.s32 %s721_s22, %s918_s26 }
   0xa   : > { %p539_p6 = scmp.ge.s32.totalorder %s725_s23, 1  ;;  %p149_p7 = scmp.eq.s32.totalorder %s146_s29, 0 }
   0xb   : > { %p811_p8 = por %p168_p5, %p167_p3  ;;  %p208_p9 = scmp.lt.s32.totalorder %s725_s23, 3 }
   0xc   : > { %s817_s6 = scalar_select %p149_p7, %s713_s20, %s151_s27  }
   0xd   : > { %p209_p10 = pnand %p539_p6, %p208_p9 }
   0xe   : > { %p238_p11 = scmp.lt.s32.totalorder (!%p209_p10), %s717_s21, 1  ;;  %vm249_vm0 = vcmask (!%p209_p10), 15360   ;;  %v727_v0 = vmov (!%p209_p10), 0.0   ;;  %s728_s12 = smov (!%p209_p10), 2   ;;  %v729_v2 = vmov (!%p209_p10), 0.0|0.0   ;;  %vm730_vm1 = vmmov (!%p209_p10), 0  }
   0xf   : > { %212 = sbr.rel (%p209_p10) target bundleno = 959 (0x3bf), region = 40  ;;  %250 = vst.msk [vmem:[#allocation2] sm:$0xff] (!%p209_p10), %vm249_vm0, %v727_v0  ;;  %251 = vst.msk [vmem:[#allocation3] sm:$0xff] (!%p209_p10), %vm249_vm0, %v727_v0  ;;  %568 = vmatprep.subr.bf16.mxu0 (!%p209_p10), %v729_v2  ;;  %571 = vmatprep.subr.bf16.mxu1 (!%p209_p10), %v729_v2  ;;  %v269_v4 = vld [vmem:[%s906_s2] sm:$0xff] (!%p209_p10)  ;;  %v731_v6 = vmov (!%p209_p10), 0   ;;  %s732_s15 = smov (!%p209_p10), 126  }
  0x10   : > { %558 = vmatprep.mubr.msk.f32.mxu0 (!%p209_p10), %vm730_vm1, %v727_v0  ;;  %565 = vmatprep.mubr.msk.f32.mxu1 (!%p209_p10), %vm730_vm1, %v727_v0  ;;  %vm265_vm2 = vcmask (!%p209_p10), 1031168   ;;  %v268_v14 = vld [vmem:[%s905_s1] sm:$0xff] (!%p209_p10)  ;;  %vm275_vm3 = vcmask (!%p209_p10), 130048   ;;  %s545_s9 = sshll.u32 (!%p209_p10), %s717_s21, 7 }
  0x11   : > { %640 = vset.pattern.permute.xlu1 (!%p209_p10), %v731_v6  ;;  %646 = vset.pattern.permute.xlu0 (!%p209_p10), %v731_v6  ;;  %v364_v20 = vld [vmem:[%s908_s4] sm:$0xff] (!%p209_p10)  ;;  %s857_s14 = scalar_lea.hbm (!%p209_p10), %s909_s5, %s545_s9 }
  0x12   : > { %272 = vperm.xlu1 (!%p209_p10), %640, %v269_v4   ;;  %v363_v30 = vld [vmem:[%s907_s3] sm:$0xff] (!%p209_p10) }
  0x16   : > { %s239_s7 = scalar_select %p238_p11, %s717_s21, 1  ;;  %v253_v3 = vld [vmem:[#allocation2] sm:$0xff]  ;;  %v350_v21 = vld [vmem:[#allocation3] sm:$0xff] }
  0x17   : > { %s733_s21 = smov [#allocation4]  }
  0x18   : > { %s541_s8 = sshll.u32 %s239_s7, 3  ;;  %s235_s7 = sand.u32 1, %s709_s19  }
  0x19   : > { %s244_s11 = scalar_lea.vmem %s904_s0, %s541_s8  ;;  %s540_s8 = sshll.u32 %s235_s7, 3 }
  0x1a   : > { %v826_v1 = vld [vmem:[%s244_s11] sm:$0xff]  ;;  %s237_s10 = scalar_lea.vmem [#allocation4], %s540_s8  ;;  %s651_s17 = sshll.u32 %s733_s21, 4  ;;  %s652_s17 = int_to_ptr.vmem [resolvable:$false] %s651_s17 }
  0x1b   : > { %255 = vrot.lane.b32.xlu0 %v826_v1, %s728_s12  ;;  %s464_s11 = sshll.u32 %s237_s10, 4  ;;  %s653_s24 = scalar_lea.vmem %s652_s17, 256  ;;  %s859_s11 = int_to_ptr.vmem [resolvable:$true] %s464_s11 }
  0x1c   : > { %s647_s16 = scalar_lea.vmem %s859_s11, 128  ;;  %p654_p1 = scmp.lt.s32.totalorder %s859_s11, %s652_s17 }
  0x1d   : > { %p648_p12 = scmp.ne.s32.totalorder %s859_s11, %s647_s16  ;;  %p655_p2 = scmp.lt.s32.totalorder %s653_s24, %s647_s16 }
  0x1f   : > { %p649_p13 = pnand %p648_p12, %p804_p4  ;;  %p656_p3 = por %p655_p2, %p654_p1 }
  0x21   : > { %p650_p0 = pneg %p649_p13 }
  0x23   : > { %p657_p5 = pnand %p656_p3, %p650_p0 }
  0x8d   : > { %v256_v5 = vpop.permute.xlu0 %255 }
  0x8e   : > { %v259_v7 = vsel %vm249_vm0, %v253_v3, %v256_v5  ;;  %447 = vst.msk [vmem:[#allocation2] sm:$0xff] %vm249_vm0, %v256_v5 }
  0x8f   : > { %v635_v8 = vpack.i.bf16 %v256_v5, %v259_v7 }
  0x91   : > { %636 = vrot.lane.b32.xlu0 %v635_v8, %s732_s15  ;;  %v273_v15 = vpop.permute.xlu1 %272 }
 0x103   : > { %v637_v9 = vpop.permute.xlu0 %636 }
 0x104   : > { %v639_v10 = vunpack.i.h.bf16 %v637_v9  ;;  %v638_v11 = vunpack.i.l.bf16 %v637_v9 }
 0x106   : > { %v266_v12 = vsel %vm265_vm2, %v638_v11, %v639_v10 }
 0x107   : > { %v569_v13 = vpack.c.bf16 %v266_v12, %v259_v7 }
 0x109   : > { %570 = vmatpush3.bf16.msra.mxu0 %v569_v13 }
 0x10c   : > { %559 = vmatmul.mubr.msk.f32.vlgmr.msra.gmra.mrb[0].mxu0 %vm275_vm3, %v268_v14 }
 0x1df   : > { %v345_v16 = vpop.f32.mrb[0].mxu0 }
 0x1e0   : > { %v346_v17 = vadd.f32 %v345_v16, %v273_v15  ;;  %v560_v18 = vpop.f32.mrb[1].mxu0 }
 0x1e2   : > { %v349_v19 = vmax.f32 %v346_v17, 0.0 }
 0x1e4   : > { %352 = vrot.lane.b32.xlu1 %v349_v19, %s728_s12 }
 0x1e8   : > { %367 = vperm.xlu1 %640, %v364_v20  }
 0x256   : > { %v353_v22 = vpop.permute.xlu1 %352 }
 0x257   : > { %v355_v23 = vsel %vm249_vm0, %v350_v21, %v353_v22  ;;  %448 = vst.msk [vmem:[#allocation3] sm:$0xff] %vm249_vm0, %v353_v22 }
 0x258   : > { %v641_v24 = vpack.i.bf16 %v353_v22, %v355_v23 }
 0x25a   : > { %642 = vrot.lane.b32.xlu0 %v641_v24, %s732_s15  ;;  %s450_s15 = scalar_lea.sflag [#allocation5], %s235_s7 }
 0x267   : > { %v368_v31 = vpop.permute.xlu1 %367 }
 0x2cc   : > { %v643_v25 = vpop.permute.xlu0 %642 }
 0x2cd   : > { %v645_v26 = vunpack.i.h.bf16 %v643_v25  ;;  %v644_v27 = vunpack.i.l.bf16 %v643_v25 }
 0x2cf   : > { %v361_v28 = vsel %vm265_vm2, %v644_v27, %v645_v26 }
 0x2d0   : > { %v572_v29 = vpack.c.bf16 %v361_v28, %v355_v23 }
 0x2d2   : > { %573 = vmatpush3.bf16.msra.mxu1 %v572_v29 }
 0x2d5   : > { %566 = vmatmul.mubr.msk.f32.vlgmr.msra.gmra.mrb[0].mxu1 %vm275_vm3, %v363_v30 }
 0x3a8   : > { %v439_v32 = vpop.f32.mrb[0].mxu1 }
 0x3a9   : > { %v440_v33 = vadd.f32 %v439_v32, %v368_v31  ;;  %v567_v34 = vpop.f32.mrb[1].mxu1 }
 0x3ab   : > { %v443_v35 = vmax.f32 %v440_v33, 0.0 }
 0x3ad   : > { %v444_v36 = vadd.f32 %v443_v35, %v826_v1 }
 0x3af   : > { %v445_v37 = vmax.f32 %v444_v36, 0.0 }
 0x3b1   : > { %446 = vst [vmem:[%s237_s10] sm:$0xff] %v445_v37 }
 0x3b2   : > { %660 = shalt.err (!%p657_p5)
}
 0x3b3   : > { %s661_s25 = scalar_lea.hbm %s857_s14, 128  ;;  %s665_s7 = scalar_lea.hbm %s909_s5, 256 }
 0x3b4   : > { %p662_p6 = scmp.ne.s32.totalorder %s857_s14, %s661_s25  ;;  %p666_p10 = scmp.lt.u32.totalorder %s857_s14, %s909_s5 }
 0x3b5   : > { %p667_p11 = scmp.lt.u32.totalorder %s665_s7, %s661_s25  ;;  %p669_p13 = scmp.lt.u32.totalorder %s661_s25, %s857_s14 }
 0x3b6   : > { %p663_p7 = pnand %p662_p6, %p804_p4 }
 0x3b7   : > { %p668_p12 = por %p667_p11, %p666_p10 }
 0x3b8   : > { %p664_p9 = pneg %p663_p7 }
 0x3b9   : > { %p670_p0 = por %p669_p13, %p668_p12 }
 0x3bb   : > { %p671_p1 = pnand %p670_p0, %p664_p9 }
 0x3bd   : > { %674 = shalt.err (!%p671_p1)
}
 0x3be   : > { %574 = dma.vmem_to_hbm [thread:$0]  (%p804_p4), %s859_s11, 128, %s857_s14, %s450_s15  }
 0x3bf PF: > { %p580_p2 = scmp.ge.s32.totalorder %s725_s23, 2  ;;  %s476_s10 = sand.u32 1, %s705_s18  }
 0x3c0   : > { %s477_s12 = scalar_lea.sflag [#allocation5], %s476_s10 }
 0x3c1   : > { %p577_p3 = pnand %p580_p2, %p811_p8 }
 0x3c3   : > { %700 = dma.done.wait (!%p577_p3), %s477_s12, 128  }
 0x3c4   : > { %702 = vsyncadd (!%p577_p3), %s477_s12, 4294967168  ;;  %s18_s23 = sadd.s32 1, %s725_s23   ;;  %s912_s18 = smov %s709_s19 }
 0x3c5   : > { %p15_p5 = scmp.ge.s32.totalorder %s18_s23, 4   ;;  %s913_s19 = smov %s713_s20 }
 0x3c6   : > { %s914_s20 = smov %s817_s6  ;;  %s915_s21 = smov %s721_s22 }
 0x3c7   : > { %s916_s22 = smov %s918_s26  ;;  %17 = sbr.rel (!%p15_p5) target bundleno = 4 (0x4), region = 79 }
 0x3ce   :  { %482 = vsyncpa [#allocation5], 1 }
 0x3cf   :  { %484 = vsyncpa [#allocation5 + $0x1], 1 }

</bundles_post_ra>
